<compile_context>
chip_gen: v7x
topology: tpu7x:2x2x1
jax: 0.10.0
libtpu: 0.0.40
codegen_flags: <defaults>
</compile_context>

<pallas_src>
import math
import functools

import jax
import jax.numpy as jnp
from jax.experimental import pallas as pl
from jax.experimental.pallas import tpu as pltpu


_MASK_VALUE = -1e30  # finite "minus infinity": avoids inf-inf NaN paths


# ----------------------------------------------------------------------------
# Tiling helpers
# ----------------------------------------------------------------------------
def _round_up(x, m):
    return ((x + m - 1) // m) * m


def _pick_tile(dim, target, align):
    """Return (tile, padded_dim) with padded_dim % tile == 0 and the tile either
    `align`-aligned or equal to the full (un-padded) dim.  Ragged large dims are
    padded up to a tile multiple instead of falling back to a giant full-dim block.
    """
    if dim <= target:
        return dim, dim                       # full-dim block: always legal, small
    if dim % target == 0:
        return target, dim
    t = (target // align) * align
    while t >= align:
        if dim % t == 0:
            return t, dim
        t -= align
    return target, _round_up(dim, target)     # pad + slice in the wrapper


def _tile_divisor(dim, target, align=8):
    """Largest tile <= target that divides dim and is align-aligned (or full dim)."""
    if dim <= target:
        return dim
    if dim % target == 0:
        return target
    t = (target // align) * align
    while t >= align:
        if dim % t == 0:
            return t
        t -= align
    # TODO(synk): pad ragged sequence lengths (+ in-kernel kv-length masking)
    # instead of a full-dim block.
    return dim


# ----------------------------------------------------------------------------
# Tiled matmul kernel:  x (M, K)  @  w (K, N)  ->  (M, N), f32 accumulation
# ----------------------------------------------------------------------------
def _matmul_kernel(x_ref, w_ref, o_ref, acc_ref):
    @pl.when(pl.program_id(2) == 0)
    def _():
        acc_ref[...] = jnp.zeros_like(acc_ref)

    acc_ref[...] += jnp.dot(
        x_ref[...], w_ref[...], preferred_element_type=jnp.float32
    )

    @pl.when(pl.program_id(2) == pl.num_programs(2) - 1)
    def _():
        o_ref[...] = acc_ref[...].astype(o_ref.dtype)


def pallas_matmul(x, w, *, tm=256, tn=256, tk=512):
    """x: (M, K) @ w: (K, N) -> (M, N).  Weights are pre-transposed (K, N)."""
    assert x.dtype == w.dtype
    M, K = x.shape
    Kw, N = w.shape
    assert K == Kw
    tm, Mp = _pick_tile(M, tm, 8)
    tn, Np = _pick_tile(N, tn, 128)
    tk, Kp = _pick_tile(K, tk, 128)
    if (Mp, Kp) != (M, K):
        x = jnp.pad(x, ((0, Mp - M), (0, Kp - K)))
    if (Kp, Np) != (K, N):
        w = jnp.pad(w, ((0, Kp - K), (0, Np - N)))

    out = pl.pallas_call(
        _matmul_kernel,
        out_shape=jax.ShapeDtypeStruct((Mp, Np), x.dtype),
        grid=(Mp // tm, Np // tn, Kp // tk),
        in_specs=[
            pl.BlockSpec((tm, tk), lambda i, j, k: (i, k)),
            pl.BlockSpec((tk, tn), lambda i, j, k: (k, j)),
        ],
        out_specs=pl.BlockSpec((tm, tn), lambda i, j, k: (i, j)),
        scratch_shapes=[pltpu.VMEM((tm, tn), jnp.float32)],
        compiler_params=pltpu.CompilerParams(
            dimension_semantics=("parallel", "parallel", "arbitrary"),
            vmem_limit_bytes=32 * 1024 * 1024,
        ),
    )(x, w)
    if (Mp, Np) != (M, N):
        out = out[:M, :N]
    return out


# ----------------------------------------------------------------------------
# Flash attention with fused RoPE prologue, in-kernel causal mask + tile skipping
# ----------------------------------------------------------------------------
def _rope(xc, xr, cos, sin):
    """xc: (rows, cd) f32 content part, xr: (rows, rd) f32 rotary part (pre-RoPE)."""
    half = xr.shape[-1] // 2
    x1, x2 = xr[:, :half], xr[:, half:]
    xr_rot = jnp.concatenate([x1 * cos - x2 * sin, x2 * cos + x1 * sin], axis=-1)
    return jnp.concatenate([xc, xr_rot], axis=-1)


def _flash_attn_kernel(q_ref, k_ref, v_ref, cq_ref, sq_ref, ck_ref, sk_ref,
                       o_ref, qs_ref, m_ref, l_ref, acc_ref,
                       *, scale, cont_dim, causal):
    qi = pl.program_id(2)
    ki = pl.program_id(3)
    blk_q = q_ref.shape[1]
    blk_k = k_ref.shape[1]

    @pl.when(ki == 0)
    def _init():
        # RoPE + softmax scale applied to the q tile once per q tile (bf16 cache).
        q = q_ref[0].astype(jnp.float32)                     # (tq, D)
        qf = _rope(q[:, :cont_dim], q[:, cont_dim:], cq_ref[...], sq_ref[...])
        qs_ref[...] = (qf * scale).astype(qs_ref.dtype)
        m_ref[...] = jnp.full(m_ref.shape, _MASK_VALUE, jnp.float32)
        l_ref[...] = jnp.zeros_like(l_ref)
        acc_ref[...] = jnp.zeros_like(acc_ref)

    def _compute():
        # K-side RoPE in the prologue (VALU work that hides under the MXU).
        k = k_ref[0].astype(jnp.float32)                     # (tk, D)
        k_rot = _rope(k[:, :cont_dim], k[:, cont_dim:],
                      ck_ref[...], sk_ref[...]).astype(qs_ref.dtype)

        # scores: (tq, tk) f32, contraction over D, no materialized transpose
        s = jax.lax.dot_general(
            qs_ref[...], k_rot, (((1,), (1,)), ((), ())),
            preferred_element_type=jnp.float32)

        if causal:
            row = qi * blk_q + jax.lax.broadcasted_iota(jnp.int32, s.shape, 0)
            col = ki * blk_k + jax.lax.broadcasted_iota(jnp.int32, s.shape, 1)
            s = jnp.where(col <= row, s, _MASK_VALUE)

        m_prev = m_ref[...]
        m_new = jnp.maximum(m_prev, jnp.max(s, axis=-1, keepdims=True))
        alpha = jnp.exp(m_prev - m_new)
        p = jnp.exp(s - m_new)
        l_ref[...] = alpha * l_ref[...] + jnp.sum(p, axis=-1, keepdims=True)
        acc_ref[...] = alpha * acc_ref[...] + jnp.dot(
            p.astype(v_ref.dtype), v_ref[0], preferred_element_type=jnp.float32)
        m_ref[...] = m_new

    if causal:
        # Skip kv tiles that lie entirely above the diagonal for this q tile.
        pl.when(ki * blk_k <= qi * blk_q + (blk_q - 1))(_compute)
    else:
        _compute()

    @pl.when(ki == pl.num_programs(3) - 1)
    def _finalize():
        inv_l = pl.reciprocal(l_ref[...], approx=True)       # EUP slot
        o_ref[0] = (acc_ref[...] * inv_l).astype(o_ref.dtype)


def pallas_flash_attention(q, kv, cos, sin, *, num_heads, head_dim, cont_dim,
                           causal, tq=128, tk=128):
    """q:  (B, S, H*D)  per-head layout [content | pre-RoPE rotary]
       kv: (B, S, 2*H*D) = [k (same layout) | v]
       cos, sin: (S, rot_dim // 2) f32 rotary tables.
    Returns (B, S, H*D) attention output in q.dtype."""
    B, S, dm = q.shape
    H, D = num_heads, head_dim
    assert dm == H * D and kv.shape == (B, S, 2 * dm)
    # lane-dense per-head column blocks need D % 128 == 0 (true for DeepSeekV3).
    # TODO(synk): pack several heads per block for head_dim < 128.
    assert D % 128 == 0 or H == 1, "head_dim must be a multiple of 128"

    tq = _tile_divisor(S, tq)
    tk = _tile_divisor(S, tk)
    nq, nk = S // tq, S // tk
    half = cos.shape[-1]
    scale = 1.0 / math.sqrt(D)

    kernel = functools.partial(
        _flash_attn_kernel, scale=scale, cont_dim=cont_dim, causal=causal)

    return pl.pallas_call(
        kernel,
        out_shape=jax.ShapeDtypeStruct((B, S, dm), q.dtype),
        grid=(B, H, nq, nk),
        in_specs=[
            pl.BlockSpec((1, tq, D), lambda b, h, qi, ki: (b, qi, h)),      # q head h
            pl.BlockSpec((1, tk, D), lambda b, h, qi, ki: (b, ki, h)),      # k head h
            pl.BlockSpec((1, tk, D), lambda b, h, qi, ki: (b, ki, H + h)),  # v head h
            pl.BlockSpec((tq, half), lambda b, h, qi, ki: (qi, 0)),         # cos (q rows)
            pl.BlockSpec((tq, half), lambda b, h, qi, ki: (qi, 0)),         # sin (q rows)
            pl.BlockSpec((tk, half), lambda b, h, qi, ki: (ki, 0)),         # cos (k rows)
            pl.BlockSpec((tk, half), lambda b, h, qi, ki: (ki, 0)),         # sin (k rows)
        ],
        out_specs=pl.BlockSpec((1, tq, D), lambda b, h, qi, ki: (b, qi, h)),
        scratch_shapes=[
            pltpu.VMEM((tq, D), q.dtype),        # RoPE'd + scaled q tile (bf16)
            pltpu.VMEM((tq, 1), jnp.float32),    # running max m
            pltpu.VMEM((tq, 1), jnp.float32),    # running denom l
            pltpu.VMEM((tq, D), jnp.float32),    # running accumulator
        ],
        compiler_params=pltpu.CompilerParams(
            dimension_semantics=("parallel", "parallel", "parallel", "arbitrary"),
            vmem_limit_bytes=32 * 1024 * 1024,
        ),
    )(q, kv, kv, cos, sin, cos, sin)


# ----------------------------------------------------------------------------
# Rotary helpers (plain JAX, matches the PyTorch reference math)
# ----------------------------------------------------------------------------
def rotate_half(x):
    x1, x2 = jnp.split(x, 2, axis=-1)
    return jnp.concatenate((-x2, x1), axis=-1)


def build_rotary_tables(rot_dim, seq_len):
    """Half-width tables cos(freqs)/sin(freqs): (seq_len, rot_dim//2) f32."""
    assert rot_dim % 2 == 0
    inv_freq = 1.0 / (10000.0 ** (jnp.arange(0, rot_dim, 2, dtype=jnp.float32) / rot_dim))
    t = jnp.arange(seq_len, dtype=jnp.float32)
    freqs = jnp.einsum("i,j->ij", t, inv_freq)
    return jnp.cos(freqs), jnp.sin(freqs)


# ----------------------------------------------------------------------------
# Module: parameters + forward
# ----------------------------------------------------------------------------
class MultiheadLatentAttention:
    def __init__(self, d_model, num_heads, latent_dim_q=None, latent_dim_kv=None,
                 max_seq_len=512, key=None, param_dtype=jnp.bfloat16):
        assert d_model % num_heads == 0
        self.d_model = d_model
        self.num_heads = num_heads
        self.head_dim = d_model // num_heads
        assert self.head_dim % 2 == 0
        self.rot_dim = self.head_dim // 2
        self.cont_dim = self.head_dim - self.rot_dim
        assert self.rot_dim % 2 == 0
        self.latent_dim_q = latent_dim_q if latent_dim_q is not None else d_model // 2
        self.latent_dim_kv = latent_dim_kv if latent_dim_kv is not None else d_model // 4
        self.max_seq_len = max_seq_len

        if key is None:
            key = jax.random.PRNGKey(0)
        ks = jax.random.split(key, 8)

        def init_linear(k, in_f, out_f):
            # weights stored pre-transposed (in_features, out_features), bf16 for the MXU
            bound = 1.0 / math.sqrt(in_f)
            w = jax.random.uniform(k, (in_f, out_f), jnp.float32, -bound, bound)
            return w.astype(param_dtype)

        H, hd, rd, cd = num_heads, self.head_dim, self.rot_dim, self.cont_dim
        n_rot = H * rd * 2
        self.W_lat_q = init_linear(ks[0], d_model, self.latent_dim_q)
        self.W_lat_kv = init_linear(ks[1], d_model, self.latent_dim_kv)
        self.W_rot_q = init_linear(ks[2], self.latent_dim_q, n_rot)
        self.W_rot_k = init_linear(ks[3], self.latent_dim_kv, n_rot)
        self.W_q_up = init_linear(ks[4], self.latent_dim_q, d_model)
        self.W_k_up = init_linear(ks[5], self.latent_dim_kv, d_model)
        self.W_v_up = init_linear(ks[6], self.latent_dim_kv, d_model)
        self.W_out = init_linear(ks[7], d_model, d_model)

        def fuse(w_up, w_rot):
            # prune the unused rot half, reorder per head to [content(cd) | rotary(rd)]
            L = w_up.shape[0]
            wu = w_up.reshape(L, H, hd)[:, :, :cd]
            wr = w_rot.reshape(L, H, 2 * rd)[:, :, :rd]
            return jnp.concatenate([wu, wr], axis=-1).reshape(L, H * hd)

        # fused projections: one matmul per latent stream (q: 1 output slab, kv: k|v)
        self.W_q_fused = fuse(self.W_q_up, self.W_rot_q)                       # (Lq, d_model)
        self.W_kv_fused = jnp.concatenate(
            [fuse(self.W_k_up, self.W_rot_k), self.W_v_up], axis=1)            # (Lkv, 2*d_model)

        self.cos_f, self.sin_f = build_rotary_tables(self.rot_dim, max_seq_len)

    def __call__(self, x, causal=False):
        # causal=True reproduces DeepSeekV3's standard additive causal mask,
        # regenerated inside the attention kernel (no S x S mask is materialized).
        # TODO(synk): arbitrary (non-causal) additive masks would need a streamed
        # mask input; only the causal / no-mask paths are implemented.
        # Dropout is identity (eval-mode semantics).
        B, S, dm = x.shape
        assert dm == self.d_model and S <= self.max_seq_len
        bs = B * S
        x2 = x.reshape(bs, dm).astype(jnp.bfloat16)

        z_q = pallas_matmul(x2, self.W_lat_q)                     # (bs, Lq)   bf16
        z_kv = pallas_matmul(x2, self.W_lat_kv)                   # (bs, Lkv)  bf16
        q = pallas_matmul(z_q, self.W_q_fused).reshape(B, S, dm)  # per-head [cont|rot]
        kv = pallas_matmul(z_kv, self.W_kv_fused).reshape(B, S, 2 * dm)

        attn = pallas_flash_attention(
            q, kv, self.cos_f[:S], self.sin_f[:S],
            num_heads=self.num_heads, head_dim=self.head_dim,
            cont_dim=self.cont_dim, causal=causal)                # (B, S, dm) bf16

        out = pallas_matmul(attn.reshape(bs, dm), self.W_out)
        return out.reshape(B, S, dm).astype(x.dtype)


# ----------------------------------------------------------------------------
# Pure-JAX reference (PyTorch math, with the kernel's bf16 precision mirrored)
# ----------------------------------------------------------------------------
def reference_forward(m, x, causal=False):
    B, S, dm = x.shape
    H, hd, rd, cd = m.num_heads, m.head_dim, m.rot_dim, m.cont_dim
    bf16 = jnp.bfloat16

    def mm(a, w):
        return jnp.dot(a.astype(bf16), w, preferred_element_type=jnp.float32).astype(bf16)

    x2 = x.reshape(B * S, dm)
    z_q = mm(x2, m.W_lat_q)
    z_kv = mm(x2, m.W_lat_kv)
    rot_q = mm(z_q, m.W_rot_q).reshape(B, S, H, 2 * rd)[..., :rd]
    rot_k = mm(z_kv, m.W_rot_k).reshape(B, S, H, 2 * rd)[..., :rd]
    q_c = mm(z_q, m.W_q_up).reshape(B, S, H, hd)[..., :cd]
    k_c = mm(z_kv, m.W_k_up).reshape(B, S, H, hd)[..., :cd]
    v = mm(z_kv, m.W_v_up).reshape(B, S, H, hd)

    cos = jnp.concatenate([m.cos_f[:S], m.cos_f[:S]], axis=-1)[None, :, None, :]
    sin = jnp.concatenate([m.sin_f[:S], m.sin_f[:S]], axis=-1)[None, :, None, :]
    q_r = rot_q.astype(jnp.float32)
    k_r = rot_k.astype(jnp.float32)
    q_r = q_r * cos + rotate_half(q_r) * sin
    k_r = k_r * cos + rotate_half(k_r) * sin

    scale = 1.0 / math.sqrt(hd)
    q = (jnp.concatenate([q_c.astype(jnp.float32), q_r], axis=-1) * scale).astype(bf16)
    k = jnp.concatenate([k_c.astype(jnp.float32), k_r], axis=-1).astype(bf16)

    q = jnp.transpose(q, (0, 2, 1, 3))
    k = jnp.transpose(k, (0, 2, 1, 3))
    v = jnp.transpose(v, (0, 2, 1, 3))
    s = jnp.einsum("bhqd,bhkd->bhqk", q, k, preferred_element_type=jnp.float32)
    if causal:
        row = jnp.arange(S)[:, None]
        col = jnp.arange(S)[None, :]
        s = jnp.where(col <= row, s, -jnp.inf)
    p = jax.nn.softmax(s, axis=-1)
    o = jnp.einsum("bhqk,bhkd->bhqd", p.astype(bf16), v,
                   preferred_element_type=jnp.float32).astype(bf16)
    o = jnp.transpose(o, (0, 2, 1, 3)).reshape(B * S, dm)
    out = mm(o, m.W_out)
    return out.reshape(B, S, dm).astype(x.dtype)


if __name__ == "__main__":
    # Small but TPU-friendly shapes: head_dim = 128 (as in DeepSeekV3), 2 kv tiles
    # so the online-softmax accumulation and causal tile-skipping are exercised.
    batch, seq_len, d_model, num_heads = 2, 256, 256, 2

    key = jax.random.PRNGKey(0)
    k_param, k_x = jax.random.split(key)

    module = MultiheadLatentAttention(
        d_model=d_model, num_heads=num_heads, max_seq_len=512, key=k_param)
    x = jax.random.normal(k_x, (batch, seq_len, d_model), dtype=jnp.float32)

    # causal path (how DeepSeekV3.forward calls the attention)
    out_causal = jax.block_until_ready(module(x, causal=True))
    ref_causal = jax.block_until_ready(reference_forward(module, x, causal=True))
    assert out_causal.shape == (batch, seq_len, d_model)
    assert out_causal.dtype == x.dtype
    max_err = float(jnp.max(jnp.abs(out_causal - ref_causal)))
    assert jnp.allclose(out_causal, ref_causal, atol=2e-3, rtol=2e-2), \
        f"mismatch vs reference (causal), max abs err {max_err}"

    # unmasked path
    out_plain = jax.block_until_ready(module(x, causal=False))
    ref_plain = reference_forward(module, x, causal=False)
    assert jnp.allclose(out_plain, ref_plain, atol=2e-3, rtol=2e-2), \
        "mismatch vs reference (unmasked)"

    print("KERNEL_OK")
</pallas_src>

<mosaic_0001>
module attributes {stable_mosaic.version = 11 : i64} {
  func.func @_matmul_kernel(%arg0: i32, %arg1: i32, %arg2: i32, %arg3: memref<256x256xbf16, #tpu.memory_space<vmem>>, %arg4: memref<256x128xbf16, #tpu.memory_space<vmem>>, %arg5: memref<256x128xbf16, #tpu.memory_space<vmem>>, %arg6: memref<256x128xf32, #tpu.memory_space<vmem>>) attributes {dimension_semantics = [#tpu.dimension_semantics<parallel>, #tpu.dimension_semantics<parallel>, #tpu.dimension_semantics<arbitrary>], iteration_bounds = array<i64: 2, 1, 1>, scalar_prefetch = 0 : i64, scratch_operands = 1 : i64, tpu.core_type = #tpu.core_type<tc>, window_params = [{transform_indices = @transform_0, window_bounds = array<i64: 256, 256>}, {transform_indices = @transform_1, window_bounds = array<i64: 256, 128>}, {transform_indices = @transform_2, window_bounds = array<i64: 256, 128>}]} {
    %c0_i32 = arith.constant 0 : i32
    %0 = arith.cmpi eq, %arg2, %c0_i32 : i32
    %1 = arith.extui %0 : i1 to i32
    %c0_i32_0 = arith.constant 0 : i32
    %2 = arith.cmpi ne, %1, %c0_i32_0 : i32
    scf.if %2 {
      %cst_10 = arith.constant 0.000000e+00 : f32
      %12 = vector.broadcast %cst_10 : f32 to vector<256x128xf32>
      %c0_11 = arith.constant 0 : index
      %c0_12 = arith.constant 0 : index
      %13 = vector.load %arg6[%c0_11, %c0_12] : memref<256x128xf32, #tpu.memory_space<vmem>>, vector<256x128xf32>
      tpu.vector_store %arg6[%c0_11, %c0_12], %12 {strides = array<i32>} : memref<256x128xf32, #tpu.memory_space<vmem>>, vector<256x128xf32>,
    } else {
    }
    %c0 = arith.constant 0 : index
    %c0_1 = arith.constant 0 : index
    %3 = vector.load %arg6[%c0, %c0_1] : memref<256x128xf32, #tpu.memory_space<vmem>>, vector<256x128xf32>
    %c0_2 = arith.constant 0 : index
    %c0_3 = arith.constant 0 : index
    %4 = vector.load %arg3[%c0_2, %c0_3] : memref<256x256xbf16, #tpu.memory_space<vmem>>, vector<256x256xbf16>
    %c0_4 = arith.constant 0 : index
    %c0_5 = arith.constant 0 : index
    %5 = vector.load %arg4[%c0_4, %c0_5] : memref<256x128xbf16, #tpu.memory_space<vmem>>, vector<256x128xbf16>
    %cst = arith.constant dense<0.000000e+00> : vector<256x128xf32>
    %6 = tpu.matmul %4, %5, %cst {dimension_numbers = #tpu.dot_dimension_numbers<[1], [0], [0], [1], [0, 0, 1, 1], [], []>} : vector<256x256xbf16>, vector<256x128xbf16>, vector<256x128xf32> -> vector<256x128xf32>
    %7 = arith.addf %3, %6 : vector<256x128xf32>
    %c0_6 = arith.constant 0 : index
    %c0_7 = arith.constant 0 : index
    %8 = vector.load %arg6[%c0_6, %c0_7] : memref<256x128xf32, #tpu.memory_space<vmem>>, vector<256x128xf32>
    tpu.vector_store %arg6[%c0_6, %c0_7], %7 {strides = array<i32>} : memref<256x128xf32, #tpu.memory_space<vmem>>, vector<256x128xf32>,
    %c0_i32_8 = arith.constant 0 : i32
    %9 = arith.cmpi eq, %arg2, %c0_i32_8 : i32
    %10 = arith.extui %9 : i1 to i32
    %c0_i32_9 = arith.constant 0 : i32
    %11 = arith.cmpi ne, %10, %c0_i32_9 : i32
    scf.if %11 {
      %c0_10 = arith.constant 0 : index
      %c0_11 = arith.constant 0 : index
      %12 = vector.load %arg6[%c0_10, %c0_11] : memref<256x128xf32, #tpu.memory_space<vmem>>, vector<256x128xf32>
      %13 = arith.truncf %12 : vector<256x128xf32> to vector<256x128xbf16>
      %c0_12 = arith.constant 0 : index
      %c0_13 = arith.constant 0 : index
      %14 = vector.load %arg5[%c0_12, %c0_13] : memref<256x128xbf16, #tpu.memory_space<vmem>>, vector<256x128xbf16>
      tpu.vector_store %arg5[%c0_12, %c0_13], %13 {strides = array<i32>} : memref<256x128xbf16, #tpu.memory_space<vmem>>, vector<256x128xbf16>,
    } else {
    }
    return
  }
  func.func @transform_0(%arg0: i32, %arg1: i32, %arg2: i32) -> (i32, i32) {
    %c0_i32 = arith.constant 0 : i32
    return %arg0, %arg2 : i32, i32
  }
  func.func @transform_1(%arg0: i32, %arg1: i32, %arg2: i32) -> (i32, i32) {
    %c0_i32 = arith.constant 0 : i32
    return %arg2, %arg1 : i32, i32
  }
  func.func @transform_2(%arg0: i32, %arg1: i32, %arg2: i32) -> (i32, i32) {
    %c0_i32 = arith.constant 0 : i32
    return %arg0, %arg1 : i32, i32
  }
}

</mosaic_0001>

<bundles_post_ra>
// kernel: tpu_custom_call.1
= control target key start
LH: loop header
LB: loop body
LE: loop exit
PB: predicated region body
PF: predicated region fallthrough
CT: control target
= control target key end

     0   :  { %7 = vsyncpa [#allocation4], 0  ;;  %s2087_s0 = inlined_call_operand.hbm [shape: bf16[512,256], index: 0, kind: input, shape index: {}]   ;;  %s2088_s1 = inlined_call_operand.hbm [shape: bf16[256,128], index: 1, kind: input, shape index: {}]   ;;  %s2089_s2 = inlined_call_operand.hbm [shape: bf16[512,128], index: 2, kind: output, shape index: {}]  }
   0x1   :  { %9 = vsyncpa [#allocation4 + $0x1], 0 }
   0x2   :  { %10 = vsyncpa [#allocation7], 0 }
   0x3   :  { %11 = vsyncpa [#allocation5], 0 }
   0x4   :  { %13 = vsyncpa [#allocation5 + $0x1], 0  ;;  %s1814_s9 = smov 0   ;;  %s1816_s10 = smov 0  }
   0x5   :  { %s1818_s11 = smov 0   ;;  %s1820_s12 = smov 0  }
   0x6   :  { %s1822_s13 = smov 0   ;;  %s1824_s14 = smov 0  }
   0x7 LB: > { %s1145_s15 = sadd.s32 4294967295, %s1788_s14   ;;  %s1146_s16 = sadd.s32 4294967294, %s1788_s14   ;;  %s1788_s14 = sphi %s1824_s14, %s19_s14   ;;  %s1784_s13 = sphi %s1822_s13, %s2113_s13   ;;  %s1780_s12 = sphi %s1820_s12, %s2112_s12   ;;  %s1776_s11 = sphi %s1818_s11, %s2111_s11   ;;  %s1772_s10 = sphi %s1816_s10, %s2110_s10   ;;  %s1768_s9 = sphi %s1814_s9, %s2109_s9  }
   0x8   : > { %p60_p0 = scmp.ne.s32.totalorder %s1772_s10, %s1768_s9  ;;  %p1848_p1 = scmp.eq.s32.totalorder %s1145_s15, 0 }
   0x9   : > { %p1852_p2 = scmp.eq.s32.totalorder %s1145_s15, 1  ;;  %p120_p3 = scmp.eq.s32.totalorder %s1146_s16, 1 }
   0xa   : > { %s2094_s17 = scalar_select %p1848_p1, 1, 0 }
   0xb   : > { %s2095_s18 = scalar_select %p1852_p2, 1, 0 }
   0xc   : > { %p1858_p4 = por %p1848_p1, %p60_p0  ;;  %p1147_p5 = scmp.ge.s32.totalorder %s1788_s14, 1 }
   0xd   : > { %p1863_p6 = por %p120_p3, %p60_p0  ;;  %p127_p7 = scmp.lt.s32.totalorder %s1788_s14, 3 }
   0xe   : > { %s2096_s19 = scalar_select %p1858_p4, 1, 0 }
   0xf   : > { %s2097_s20 = scalar_select %p1863_p6, 1, 0 }
  0x10   : > { %p1868_p8 = pnand %p1147_p5, %p127_p7  ;;  %s1790_s22 = smov [#allocation6]  }
  0x11   : > { %s143_s23 = sshll.u32 %s1790_s22, 4  ;;  %s38_s25 = sadd.s32 1, %s1784_s13  ;;  %s144_s23 = int_to_ptr.vmem [resolvable:$true] %s143_s23 }
  0x12   : > { %s2098_s21 = scalar_select %p1868_p8, 1, 0 }
  0x13   : > { %p1509_p9 = pneg %p1868_p8  ;;  %s1644_s28 = scalar_lea.hbm %s2088_s1, 2048 }
  0x14   : > { %p1645_p12 = scmp.ne.s32.totalorder %s2088_s1, %s1644_s28  ;;  %p1651_p5 = scmp.lt.u32.totalorder %s1644_s28, %s2088_s1 }
  0x15   : > { %p1877_p11 = pnand %p1509_p9, %p1848_p1 }
  0x17   : > { %p1646_p13 = pneg %p1877_p11 }
  0x19   : > { %p1647_p0 = pnand %p1646_p13, %p1645_p12 }
  0x1b   : > { %p1648_p3 = pneg %p1647_p0 }
  0x1d   : > { %p1653_p7 = pnand %p1651_p5, %p1648_p3 }
  0x1f   : > { %1656 = shalt.err (!%p1653_p7)
}
  0x20   : > { %s1657_s5 = scalar_lea.vmem %s144_s23, 2048  ;;  %p1665_p1 = scmp.lt.s32.totalorder %s144_s23, %s144_s23 }
  0x21   : > { %p1658_p9 = scmp.ne.s32.totalorder %s144_s23, %s1657_s5  ;;  %p1666_p4 = scmp.lt.s32.totalorder %s1657_s5, %s1657_s5 }
  0x23   : > { %p1660_p10 = pnand %p1658_p9, %p1646_p13  ;;  %p1667_p8 = por %p1666_p4, %p1665_p1 }
  0x25   : > { %p1661_p6 = pneg %p1660_p10 }
  0x27   : > { %p1668_p2 = pnand %p1667_p8, %p1661_p6 }
  0x29   : > { %1671 = shalt.err (!%p1668_p2)
}
  0x2a   : > { %s1791_s6 = smov 64   ;;  %s1792_s7 = smov 4  }
  0x2b   : > { %1512 = dma.hbm_to_vmem [thread:$0]  (!%p1877_p11), %s2088_s1, 2048, %s144_s23, [#allocation7], %s1791_s6, %s1791_s6, %s1792_s7  }
  0x2c   : > { %p40_p1 = scmp.ge.s32.totalorder %s38_s25, 2  ;;  %s47_s16 = sadd.s32 1, %s1776_s11 }
  0x2d   : > { %p54_p2 = scmp.ne.s32.totalorder %s1776_s11, %s1772_s10  ;;  %p55_p4 = scmp.eq.s32.totalorder %s1788_s14, 0 }
  0x2e   : > { %s2115_s25 = smov (%p40_p1, %s38_s25), 0  ;;  %p2101_p8 = scmp.ne.s32.totalorder %s2095_s18, 0 }
  0x2f   : > { %p1904_p6 = por %p55_p4, %p54_p2  ;;  %s42_s24 = ssub.s32 %s1784_s13, %s2115_s25 }
  0x30   : > { %p1910_p10 = por %p2101_p8, %p54_p2  ;;  %p1522_p12 = scmp.lt.s32.totalorder %s1788_s14, 2 }
  0x31   : > { %p45_p11 = scmp.eq.s32.totalorder %s42_s24, 0  ;;  %s157_s23 = sand.u32 1, %s1776_s11  }
  0x32   : > { %s1150_s27 = sshll.u32 %s157_s23, 8  ;;  %s1244_s29 = sshll.u32 %s1784_s13, 12 }
  0x33   : > { %s1919_s28 = scalar_select %p45_p11, %s1776_s11, %s47_s16  }
  0x34   : > { %s1925_s4 = scalar_lea.hbm %s2087_s0, %s1244_s29  ;;  %s161_s18 = scalar_lea.vmem [#allocation3], %s1150_s27 }
  0x35   : > { %s171_s5 = sshll.u32 %s161_s18, 4  ;;  %p1931_p13 = pnand %p1522_p12, %p1904_p6  ;;  %s1927_s5 = int_to_ptr.vmem [resolvable:$true] %s171_s5 }
  0x36   : > { %s1935_s7 = scalar_lea.sflag [#allocation4], %s157_s23  ;;  %s1672_s8 = scalar_lea.hbm %s1925_s4, 4096 }
  0x37   : > { %p1673_p0 = scmp.ne.s32.totalorder %s1925_s4, %s1672_s8  ;;  %p1674_p3 = pneg %p1931_p13 }
  0x38   : > { %s1677_s22 = scalar_lea.hbm %s2087_s0, 8192  ;;  %p1678_p9 = scmp.lt.u32.totalorder %s1925_s4, %s2087_s0 }
  0x39   : > { %p1675_p5 = pnand %p1674_p3, %p1673_p0  ;;  %p1679_p1 = scmp.lt.u32.totalorder %s1677_s22, %s1672_s8 }
  0x3a   : > { %p1681_p4 = scmp.lt.u32.totalorder %s1672_s8, %s1925_s4 }
  0x3b   : > { %p1676_p7 = pneg %p1675_p5  ;;  %p1680_p2 = por %p1679_p1, %p1678_p9 }
  0x3d   : > { %p1682_p6 = por %p1681_p4, %p1680_p2 }
  0x3f   : > { %p1683_p8 = pnand %p1682_p6, %p1676_p7 }
  0x41   : > { %1686 = shalt.err (!%p1683_p8)
}
  0x42   : > { %s1687_s23 = scalar_lea.vmem %s1927_s5, 4096  ;;  %s1793_s29 = smov [#allocation3]  }
  0x43   : > { %p1688_p12 = scmp.ne.s32.totalorder %s1927_s5, %s1687_s23  ;;  %s1692_s30 = sshll.u32 %s1793_s29, 4  ;;  %s1693_s30 = int_to_ptr.vmem [resolvable:$false] %s1692_s30 }
  0x44   : > { %s1694_s3 = scalar_lea.vmem %s1693_s30, 8192  ;;  %p1695_p5 = scmp.lt.s32.totalorder %s1927_s5, %s1693_s30 }
  0x45   : > { %p1690_p11 = pnand %p1688_p12, %p1674_p3  ;;  %p1696_p9 = scmp.lt.s32.totalorder %s1694_s3, %s1687_s23 }
  0x47   : > { %p1691_p0 = pneg %p1690_p11  ;;  %p1697_p1 = por %p1696_p9, %p1695_p5 }
  0x49   : > { %p1698_p2 = pnand %p1697_p1, %p1691_p0 }
  0x4b   : > { %1701 = shalt.err (!%p1698_p2)
}
  0x4c   : > { %s1794_s18 = smov 128   ;;  %s1795_s8 = smov 8  }
  0x4d   : > { %1516 = dma.hbm_to_vmem [thread:$0]  (!%p1931_p13), %s1925_s4, 4096, %s1927_s5, %s1935_s7, %s1794_s18, %s1794_s18, %s1795_s8  }
  0x4e   : > { %p2104_p3 = scmp.ne.s32.totalorder %s2098_s21, 0 }
  0x4f   : > { %s1966_s15 = sand.u32 (!%p2104_p3), 1, %s1772_s10   ;;  %p2105_p7 = scmp.ne.s32.totalorder (!%p2104_p3), %s2096_s19, 0 }
  0x50   : > { %183 = sbr.rel (%p2104_p3) target bundleno = 414 (0x19e), region = 28  ;;  %s1155_s16 = sshll.u32 (!%p2104_p3), %s1966_s15, 8 }
  0x51   : > { %s186_s22 = scalar_lea.sflag (!%p2104_p3), [#allocation4], %s1966_s15  ;;  %s1970_s24 = scalar_lea.vmem (!%p2104_p3), [#allocation3], %s1155_s16 }
  0x57   : > { %1755 = dma.done.wait (%p2105_p7), %s186_s22, 4096  }
  0x58   : > { %1757 = vsyncadd (%p2105_p7), %s186_s22, 4294963200  ;;  %p2106_p13 = scmp.ne.s32.totalorder %s2094_s17, 0 }
  0x5a   : > { %1759 = dma.done.wait (%p2106_p13), [#allocation7], 2048  }
  0x5b   : > { %1761 = vsyncadd (%p2106_p13), [#allocation7], 4294965248  ;;  %v1580_v0 = vld [vmem:[#allocation6 + $0x40] sm:$0xff]   ;;  %v1582_v2 = vld [vmem:[#allocation6 + $0x48] sm:$0xff]   ;;  %s1157_s17 = sshll.u32 %s1966_s15, 7  ;;  %s1277_s21 = sshll.u32 %s1780_s12, 11 }
  0x5c   : > { %v1581_v1 = vld [vmem:[#allocation6] sm:$0xff]   ;;  %1373 = vmatprep.subr.bf16.mxu0 %v1580_v0  ;;  %1485 = vmatprep.subr.bf16.mxu1 %v1580_v0  ;;  %v1583_v3 = vld [vmem:[#allocation6 + $0x8] sm:$0xff]   ;;  %v1584_v4 = vld [vmem:[#allocation6 + $0x50] sm:$0xff]   ;;  %s2013_s19 = scalar_lea.vmem [#allocation8], %s1157_s17  ;;  %s2034_s7 = scalar_lea.hbm %s2089_s2, %s1277_s21 }
  0x5d   : > { %1374 = vmatpush3.bf16.msra.mxu0 %v1581_v1  ;;  %1493 = vmatpush3.bf16.msra.mxu1 %v1581_v1  ;;  %v1585_v5 = vld [vmem:[#allocation6 + $0x10] sm:$0xff]   ;;  %v1586_v6 = vld [vmem:[#allocation6 + $0x58] sm:$0xff]   ;;  %v1588_v8 = vld [vmem:[#allocation6 + $0x60] sm:$0xff]   ;;  %s1042_s4 = sshll.u32 %s2013_s19, 4  ;;  %s1028_s12 = scalar_lea.sflag [#allocation5], %s1966_s15  ;;  %s2036_s4 = int_to_ptr.vmem [resolvable:$true] %s1042_s4 }
  0x5e   : > { %1375 = vmatprep.subr.bf16.mxu0 %v1582_v2  ;;  %1486 = vmatprep.subr.bf16.mxu1 %v1582_v2  ;;  %v1587_v7 = vld [vmem:[#allocation6 + $0x18] sm:$0xff]   ;;  %v1589_v9 = vld [vmem:[#allocation6 + $0x20] sm:$0xff]   ;;  %v1590_v10 = vld [vmem:[#allocation6 + $0x68] sm:$0xff]   ;;  %s1702_s27 = scalar_lea.vmem %s2036_s4, 2048  ;;  %s1796_s23 = smov [#allocation8]  }
  0x5f   : > { %v1598_v11 = vld [vmem:[%s1970_s24 + $0x4] ss:$8 sps:$4 sm:$0xff]   ;;  %v1592_v14 = vld [vmem:[#allocation6 + $0x70] sm:$0xff]   ;;  %v1594_v16 = vld [vmem:[#allocation6 + $0x78] sm:$0xff]   ;;  %p1703_p4 = scmp.ne.s32.totalorder %s2036_s4, %s1702_s27  ;;  %s1706_s29 = sshll.u32 %s1796_s23, 4  ;;  %s1707_s29 = int_to_ptr.vmem [resolvable:$false] %s1706_s29 }
  0x60   : > { %v1601_v12 = vld [vmem:[%s1970_s24 + $0x84] ss:$8 sps:$4 sm:$0xff]   ;;  %639 = vmatprep.mubr.bf16.mxu0 %v1598_v11  ;;  %v1593_v15 = vld [vmem:[#allocation6 + $0x30] sm:$0xff]   ;;  %v1595_v17 = vld [vmem:[#allocation6 + $0x38] sm:$0xff]   ;;  %s1708_s30 = scalar_lea.vmem %s1707_s29, 4096  ;;  %p1709_p12 = scmp.lt.s32.totalorder %s2036_s4, %s1707_s29 }
  0x61   : > { %1376 = vmatpush3.bf16.msra.mxu0 %v1583_v3  ;;  %1494 = vmatpush3.bf16.msra.mxu1 %v1583_v3  ;;  %v1591_v13 = vld [vmem:[#allocation6 + $0x28] sm:$0xff]   ;;  %v1602_v20 = vld [vmem:[%s1970_s24 + $0x14] ss:$8 sps:$4 sm:$0xff]   ;;  %v1606_v22 = vld [vmem:[%s1970_s24 + $0x10] ss:$8 sps:$4 sm:$0xff]   ;;  %p1704_p6 = pnand %p1703_p4, %p1910_p10  ;;  %p1710_p11 = scmp.lt.s32.totalorder %s1708_s30, %s1702_s27 }
  0x62   : > { %1377 = vmatprep.subr.bf16.mxu0 %v1584_v4  ;;  %1487 = vmatprep.subr.bf16.mxu1 %v1584_v4  ;;  %v1596_v18 = vld [vmem:[%s1970_s24] ss:$8 sps:$4 sm:$0xff]   ;;  %v1604_v21 = vld [vmem:[%s1970_s24 + $0x94] ss:$8 sps:$4 sm:$0xff]   ;;  %v1607_v23 = vld [vmem:[%s1970_s24 + $0x90] ss:$8 sps:$4 sm:$0xff]  }
  0x63   : > { %703 = vmatprep.mubr.bf16.mxu1 %v1601_v12  ;;  %v1599_v19 = vld [vmem:[%s1970_s24 + $0x80] ss:$8 sps:$4 sm:$0xff]   ;;  %v1608_v24 = vld [vmem:[%s1970_s24 + $0x24] ss:$8 sps:$4 sm:$0xff]   ;;  %v1614_v28 = vld [vmem:[%s1970_s24 + $0x34] ss:$8 sps:$4 sm:$0xff]   ;;  %p1705_p8 = pneg %p1704_p6  ;;  %p1711_p0 = por %p1710_p11, %p1709_p12 }
  0x64   : > { %v1610_v25 = vld [vmem:[%s1970_s24 + $0xa4] ss:$8 sps:$4 sm:$0xff]   ;;  %v1612_v26 = vld [vmem:[%s1970_s24 + $0x20] ss:$8 sps:$4 sm:$0xff]   ;;  %v1616_v29 = vld [vmem:[%s1970_s24 + $0xb4] ss:$8 sps:$4 sm:$0xff]  }
  0x65   : > { %1378 = vmatpush3.bf16.msra.mxu0 %v1585_v5  ;;  %1495 = vmatpush3.bf16.msra.mxu1 %v1585_v5  ;;  %v1613_v27 = vld [vmem:[%s1970_s24 + $0xa0] ss:$8 sps:$4 sm:$0xff]   ;;  %v1618_v30 = vld [vmem:[%s1970_s24 + $0x30] ss:$8 sps:$4 sm:$0xff]   ;;  %v1620_v32 = vld [vmem:[%s1970_s24 + $0x44] ss:$8 sps:$4 sm:$0xff]   ;;  %p1712_p5 = pnand %p1711_p0, %p1705_p8 }
  0x66   : > { %1379 = vmatprep.subr.bf16.mxu0 %v1586_v6  ;;  %1488 = vmatprep.subr.bf16.mxu1 %v1586_v6  ;;  %v1619_v31 = vld [vmem:[%s1970_s24 + $0xb0] ss:$8 sps:$4 sm:$0xff]   ;;  %v1622_v33 = vld [vmem:[%s1970_s24 + $0xc4] ss:$8 sps:$4 sm:$0xff]   ;;  %v1624_v34 = vld [vmem:[%s1970_s24 + $0x40] ss:$8 sps:$4 sm:$0xff]  }
  0x67   : > { %v1625_v35 = vld [vmem:[%s1970_s24 + $0xc0] ss:$8 sps:$4 sm:$0xff]   ;;  %v1626_v36 = vld [vmem:[%s1970_s24 + $0x54] ss:$8 sps:$4 sm:$0xff]   ;;  %v1630_v38 = vld [vmem:[%s1970_s24 + $0x50] ss:$8 sps:$4 sm:$0xff]  }
  0x68   : > { %v1628_v37 = vld [vmem:[%s1970_s24 + $0xd4] ss:$8 sps:$4 sm:$0xff]   ;;  %v1631_v39 = vld [vmem:[%s1970_s24 + $0xd0] ss:$8 sps:$4 sm:$0xff]   ;;  %v1632_v40 = vld [vmem:[%s1970_s24 + $0x64] ss:$8 sps:$4 sm:$0xff]  }
  0x69   : > { %1380 = vmatpush3.bf16.msra.mxu0 %v1587_v7  ;;  %1496 = vmatpush3.bf16.msra.mxu1 %v1587_v7  ;;  %v1634_v41 = vld [vmem:[%s1970_s24 + $0xe4] ss:$8 sps:$4 sm:$0xff]   ;;  %v1636_v42 = vld [vmem:[%s1970_s24 + $0x60] ss:$8 sps:$4 sm:$0xff]   ;;  %v1638_v44 = vld [vmem:[%s1970_s24 + $0x74] ss:$8 sps:$4 sm:$0xff]  }
  0x6a   : > { %1381 = vmatprep.subr.bf16.mxu0 %v1588_v8  ;;  %1489 = vmatprep.subr.bf16.mxu1 %v1588_v8  ;;  %v1637_v43 = vld [vmem:[%s1970_s24 + $0xe0] ss:$8 sps:$4 sm:$0xff]   ;;  %v1640_v45 = vld [vmem:[%s1970_s24 + $0xf4] ss:$8 sps:$4 sm:$0xff]   ;;  %v1642_v46 = vld [vmem:[%s1970_s24 + $0x70] ss:$8 sps:$4 sm:$0xff]  }
  0x6b   : > { %v1643_v47 = vld [vmem:[%s1970_s24 + $0xf0] ss:$8 sps:$4 sm:$0xff]  }
  0x6d   : > { %1382 = vmatpush3.bf16.msra.mxu0 %v1589_v9  ;;  %1497 = vmatpush3.bf16.msra.mxu1 %v1589_v9 }
  0x6e   : > { %1383 = vmatprep.subr.bf16.mxu0 %v1590_v10  ;;  %1490 = vmatprep.subr.bf16.mxu1 %v1590_v10 }
  0x71   : > { %1384 = vmatpush3.bf16.msra.mxu0 %v1591_v13  ;;  %1498 = vmatpush3.bf16.msra.mxu1 %v1591_v13 }
  0x72   : > { %1385 = vmatprep.subr.bf16.mxu0 %v1592_v14  ;;  %1491 = vmatprep.subr.bf16.mxu1 %v1592_v14 }
  0x75   : > { %1386 = vmatpush3.bf16.msra.mxu0 %v1593_v15  ;;  %1499 = vmatpush3.bf16.msra.mxu1 %v1593_v15 }
  0x76   : > { %1387 = vmatprep.subr.bf16.mxu0 %v1594_v16  ;;  %1492 = vmatprep.subr.bf16.mxu1 %v1594_v16 }
  0x79   : > { %1388 = vmatpush3.bf16.msra.mxu0 %v1595_v17  ;;  %1500 = vmatpush3.bf16.msra.mxu1 %v1595_v17 }
  0x7c   : > { %640 = vmatmul.mubr.bf16.vlgmr.msra.gmra.mrb[0].mxu0 %v1596_v18  ;;  %704 = vmatmul.mubr.bf16.vlgmr.msra.gmra.mrb[0].mxu1 %v1599_v19 }
  0x7d   : > { %647 = vmatprep.mubr.bf16.mxu0 %v1602_v20  ;;  %711 = vmatprep.mubr.bf16.mxu1 %v1604_v21 }
  0x84   : > { %648 = vmatmul.mubr.bf16.gmra.mrb[4].mxu0 %v1606_v22  ;;  %712 = vmatmul.mubr.bf16.gmra.mrb[4].mxu1 %v1607_v23 }
  0x85   : > { %655 = vmatprep.mubr.bf16.mxu0 %v1608_v24  ;;  %719 = vmatprep.mubr.bf16.mxu1 %v1610_v25 }
  0x8c   : > { %656 = vmatmul.mubr.bf16.gmra.mrb[8].mxu0 %v1612_v26  ;;  %720 = vmatmul.mubr.bf16.gmra.mrb[8].mxu1 %v1613_v27 }
  0x8d   : > { %663 = vmatprep.mubr.bf16.mxu0 %v1614_v28  ;;  %727 = vmatprep.mubr.bf16.mxu1 %v1616_v29 }
  0x94   : > { %664 = vmatmul.mubr.bf16.gmra.mrb[12].mxu0 %v1618_v30  ;;  %728 = vmatmul.mubr.bf16.gmra.mrb[12].mxu1 %v1619_v31 }
  0x95   : > { %671 = vmatprep.mubr.bf16.mxu0 %v1620_v32  ;;  %735 = vmatprep.mubr.bf16.mxu1 %v1622_v33 }
  0x9c   : > { %672 = vmatmul.mubr.bf16.gmra.mrb[16].mxu0 %v1624_v34  ;;  %736 = vmatmul.mubr.bf16.gmra.mrb[16].mxu1 %v1625_v35 }
  0x9d   : > { %679 = vmatprep.mubr.bf16.mxu0 %v1626_v36  ;;  %743 = vmatprep.mubr.bf16.mxu1 %v1628_v37 }
  0xa4   : > { %680 = vmatmul.mubr.bf16.gmra.mrb[20].mxu0 %v1630_v38  ;;  %744 = vmatmul.mubr.bf16.gmra.mrb[20].mxu1 %v1631_v39 }
  0xa5   : > { %687 = vmatprep.mubr.bf16.mxu0 %v1632_v40  ;;  %751 = vmatprep.mubr.bf16.mxu1 %v1634_v41 }
  0xac   : > { %688 = vmatmul.mubr.bf16.gmra.mrb[24].mxu0 %v1636_v42  ;;  %752 = vmatmul.mubr.bf16.gmra.mrb[24].mxu1 %v1637_v43 }
  0xad   : > { %695 = vmatprep.mubr.bf16.mxu0 %v1638_v44  ;;  %759 = vmatprep.mubr.bf16.mxu1 %v1640_v45 }
  0xb4   : > { %696 = vmatmul.mubr.bf16.gmra.mrb[28].mxu0 %v1642_v46  ;;  %760 = vmatmul.mubr.bf16.gmra.mrb[28].mxu1 %v1643_v47 }
 0x14f   : > { %v1389_v48 = vpop.f32.mrb[0].mxu0  ;;  %v1437_v49 = vpop.f32.mrb[0].mxu1 }
 0x150   : > { %v1390_v50 = vpop.f32.mrb[1].mxu0  ;;  %v1438_v51 = vpop.f32.mrb[1].mxu1 }
 0x151   : > { %v1391_v52 = vadd.f32 %v1390_v50, %v1389_v48  ;;  %v1439_v53 = vadd.f32 %v1438_v51, %v1437_v49  ;;  %v1392_v54 = vpop.f32.mrb[2].mxu0  ;;  %v1440_v55 = vpop.f32.mrb[2].mxu1 }
 0x152   : > { %v1393_v56 = vpop.f32.mrb[3].mxu0  ;;  %v1441_v57 = vpop.f32.mrb[3].mxu1 }
 0x153   : > { %v1394_v58 = vadd.f32 %v1393_v56, %v1392_v54  ;;  %v1442_v59 = vadd.f32 %v1441_v57, %v1440_v55 }
 0x155   : > { %v1281_v60 = vpack.c.bf16 %v1394_v58, %v1391_v52  ;;  %v1321_v61 = vpack.c.bf16 %v1442_v59, %v1439_v53 }
 0x157   : > { %1282 = vst [vmem:[%s2013_s19] sm:$0xff] %v1281_v60   ;;  %1365 = vst [vmem:[%s2013_s19 + $0x40] sm:$0xff] %v1321_v61   ;;  %v1395_v62 = vpop.f32.mrb[4].mxu0  ;;  %v1443_v63 = vpop.f32.mrb[4].mxu1 }
 0x158   : > { %v1396_v0 = vpop.f32.mrb[5].mxu0  ;;  %v1444_v1 = vpop.f32.mrb[5].mxu1 }
 0x159   : > { %v1397_v2 = vadd.f32 %v1396_v0, %v1395_v62  ;;  %v1445_v3 = vadd.f32 %v1444_v1, %v1443_v63  ;;  %v1398_v4 = vpop.f32.mrb[6].mxu0  ;;  %v1446_v5 = vpop.f32.mrb[6].mxu1 }
 0x15a   : > { %v1399_v6 = vpop.f32.mrb[7].mxu0  ;;  %v1447_v7 = vpop.f32.mrb[7].mxu1 }
 0x15b   : > { %v1400_v8 = vadd.f32 %v1399_v6, %v1398_v4  ;;  %v1448_v9 = vadd.f32 %v1447_v7, %v1446_v5 }
 0x15d   : > { %v1286_v10 = vpack.c.bf16 %v1400_v8, %v1397_v2  ;;  %v1326_v11 = vpack.c.bf16 %v1448_v9, %v1445_v3 }
 0x15f   : > { %1358 = vst [vmem:[%s2013_s19 + $0x8] sm:$0xff] %v1286_v10   ;;  %1366 = vst [vmem:[%s2013_s19 + $0x48] sm:$0xff] %v1326_v11   ;;  %v1401_v12 = vpop.f32.mrb[8].mxu0  ;;  %v1449_v13 = vpop.f32.mrb[8].mxu1 }
 0x160   : > { %v1402_v14 = vpop.f32.mrb[9].mxu0  ;;  %v1450_v15 = vpop.f32.mrb[9].mxu1 }
 0x161   : > { %v1403_v16 = vadd.f32 %v1402_v14, %v1401_v12  ;;  %v1451_v17 = vadd.f32 %v1450_v15, %v1449_v13  ;;  %v1404_v18 = vpop.f32.mrb[10].mxu0  ;;  %v1452_v19 = vpop.f32.mrb[10].mxu1 }
 0x162   : > { %v1405_v20 = vpop.f32.mrb[11].mxu0  ;;  %v1453_v21 = vpop.f32.mrb[11].mxu1 }
 0x163   : > { %v1406_v22 = vadd.f32 %v1405_v20, %v1404_v18  ;;  %v1454_v23 = vadd.f32 %v1453_v21, %v1452_v19 }
 0x165   : > { %v1291_v24 = vpack.c.bf16 %v1406_v22, %v1403_v16  ;;  %v1331_v25 = vpack.c.bf16 %v1454_v23, %v1451_v17 }
 0x167   : > { %1359 = vst [vmem:[%s2013_s19 + $0x10] sm:$0xff] %v1291_v24   ;;  %1367 = vst [vmem:[%s2013_s19 + $0x50] sm:$0xff] %v1331_v25   ;;  %v1407_v26 = vpop.f32.mrb[12].mxu0  ;;  %v1455_v27 = vpop.f32.mrb[12].mxu1 }
 0x168   : > { %v1408_v28 = vpop.f32.mrb[13].mxu0  ;;  %v1456_v29 = vpop.f32.mrb[13].mxu1 }
 0x169   : > { %v1409_v30 = vadd.f32 %v1408_v28, %v1407_v26  ;;  %v1457_v31 = vadd.f32 %v1456_v29, %v1455_v27  ;;  %v1410_v32 = vpop.f32.mrb[14].mxu0  ;;  %v1458_v33 = vpop.f32.mrb[14].mxu1 }
 0x16a   : > { %v1411_v34 = vpop.f32.mrb[15].mxu0  ;;  %v1459_v35 = vpop.f32.mrb[15].mxu1 }
 0x16b   : > { %v1412_v36 = vadd.f32 %v1411_v34, %v1410_v32  ;;  %v1460_v37 = vadd.f32 %v1459_v35, %v1458_v33 }
 0x16d   : > { %v1296_v38 = vpack.c.bf16 %v1412_v36, %v1409_v30  ;;  %v1336_v39 = vpack.c.bf16 %v1460_v37, %v1457_v31 }
 0x16f   : > { %1360 = vst [vmem:[%s2013_s19 + $0x18] sm:$0xff] %v1296_v38   ;;  %1368 = vst [vmem:[%s2013_s19 + $0x58] sm:$0xff] %v1336_v39   ;;  %v1413_v40 = vpop.f32.mrb[16].mxu0  ;;  %v1461_v41 = vpop.f32.mrb[16].mxu1 }
 0x170   : > { %v1414_v42 = vpop.f32.mrb[17].mxu0  ;;  %v1462_v43 = vpop.f32.mrb[17].mxu1 }
 0x171   : > { %v1415_v44 = vadd.f32 %v1414_v42, %v1413_v40  ;;  %v1463_v45 = vadd.f32 %v1462_v43, %v1461_v41  ;;  %v1416_v46 = vpop.f32.mrb[18].mxu0  ;;  %v1464_v47 = vpop.f32.mrb[18].mxu1 }
 0x172   : > { %v1417_v48 = vpop.f32.mrb[19].mxu0  ;;  %v1465_v49 = vpop.f32.mrb[19].mxu1 }
 0x173   : > { %v1418_v50 = vadd.f32 %v1417_v48, %v1416_v46  ;;  %v1466_v51 = vadd.f32 %v1465_v49, %v1464_v47 }
 0x175   : > { %v1301_v52 = vpack.c.bf16 %v1418_v50, %v1415_v44  ;;  %v1341_v53 = vpack.c.bf16 %v1466_v51, %v1463_v45 }
 0x177   : > { %1361 = vst [vmem:[%s2013_s19 + $0x20] sm:$0xff] %v1301_v52   ;;  %1369 = vst [vmem:[%s2013_s19 + $0x60] sm:$0xff] %v1341_v53   ;;  %v1419_v54 = vpop.f32.mrb[20].mxu0  ;;  %v1467_v55 = vpop.f32.mrb[20].mxu1 }
 0x178   : > { %v1420_v56 = vpop.f32.mrb[21].mxu0  ;;  %v1468_v57 = vpop.f32.mrb[21].mxu1 }
 0x179   : > { %v1421_v58 = vadd.f32 %v1420_v56, %v1419_v54  ;;  %v1469_v59 = vadd.f32 %v1468_v57, %v1467_v55  ;;  %v1422_v60 = vpop.f32.mrb[22].mxu0  ;;  %v1470_v61 = vpop.f32.mrb[22].mxu1 }
 0x17a   : > { %v1423_v62 = vpop.f32.mrb[23].mxu0  ;;  %v1471_v63 = vpop.f32.mrb[23].mxu1 }
 0x17b   : > { %v1424_v0 = vadd.f32 %v1423_v62, %v1422_v60  ;;  %v1472_v1 = vadd.f32 %v1471_v63, %v1470_v61 }
 0x17d   : > { %v1306_v2 = vpack.c.bf16 %v1424_v0, %v1421_v58  ;;  %v1346_v3 = vpack.c.bf16 %v1472_v1, %v1469_v59 }
 0x17f   : > { %1362 = vst [vmem:[%s2013_s19 + $0x28] sm:$0xff] %v1306_v2   ;;  %1370 = vst [vmem:[%s2013_s19 + $0x68] sm:$0xff] %v1346_v3   ;;  %v1425_v4 = vpop.f32.mrb[24].mxu0  ;;  %v1473_v5 = vpop.f32.mrb[24].mxu1 }
 0x180   : > { %v1426_v6 = vpop.f32.mrb[25].mxu0  ;;  %v1474_v7 = vpop.f32.mrb[25].mxu1 }
 0x181   : > { %v1427_v8 = vadd.f32 %v1426_v6, %v1425_v4  ;;  %v1475_v9 = vadd.f32 %v1474_v7, %v1473_v5  ;;  %v1428_v10 = vpop.f32.mrb[26].mxu0  ;;  %v1476_v11 = vpop.f32.mrb[26].mxu1 }
 0x182   : > { %v1429_v12 = vpop.f32.mrb[27].mxu0  ;;  %v1477_v13 = vpop.f32.mrb[27].mxu1 }
 0x183   : > { %v1430_v14 = vadd.f32 %v1429_v12, %v1428_v10  ;;  %v1478_v15 = vadd.f32 %v1477_v13, %v1476_v11 }
 0x185   : > { %v1311_v16 = vpack.c.bf16 %v1430_v14, %v1427_v8  ;;  %v1351_v17 = vpack.c.bf16 %v1478_v15, %v1475_v9 }
 0x187   : > { %1363 = vst [vmem:[%s2013_s19 + $0x30] sm:$0xff] %v1311_v16   ;;  %1371 = vst [vmem:[%s2013_s19 + $0x70] sm:$0xff] %v1351_v17   ;;  %v1431_v18 = vpop.f32.mrb[28].mxu0  ;;  %v1479_v19 = vpop.f32.mrb[28].mxu1 }
 0x188   : > { %v1432_v20 = vpop.f32.mrb[29].mxu0  ;;  %v1480_v21 = vpop.f32.mrb[29].mxu1 }
 0x189   : > { %v1433_v22 = vadd.f32 %v1432_v20, %v1431_v18  ;;  %v1481_v23 = vadd.f32 %v1480_v21, %v1479_v19  ;;  %v1434_v24 = vpop.f32.mrb[30].mxu0  ;;  %v1482_v25 = vpop.f32.mrb[30].mxu1 }
 0x18a   : > { %v1435_v26 = vpop.f32.mrb[31].mxu0  ;;  %v1483_v27 = vpop.f32.mrb[31].mxu1 }
 0x18b   : > { %v1436_v28 = vadd.f32 %v1435_v26, %v1434_v24  ;;  %v1484_v29 = vadd.f32 %v1483_v27, %v1482_v25 }
 0x18d   : > { %v1316_v30 = vpack.c.bf16 %v1436_v28, %v1433_v22  ;;  %v1356_v31 = vpack.c.bf16 %v1484_v29, %v1481_v23 }
 0x18f   : > { %1364 = vst [vmem:[%s2013_s19 + $0x38] sm:$0xff] %v1316_v30   ;;  %1372 = vst [vmem:[%s2013_s19 + $0x78] sm:$0xff] %v1356_v31  }
 0x190   : > { %1715 = shalt.err (!%p1712_p5)
}
 0x191   : > { %s1716_s3 = scalar_lea.hbm %s2034_s7, 2048  ;;  %s1720_s16 = scalar_lea.hbm %s2089_s2, 4096 }
 0x192   : > { %p1717_p9 = scmp.ne.s32.totalorder %s2034_s7, %s1716_s3  ;;  %p1721_p3 = scmp.lt.u32.totalorder %s2034_s7, %s2089_s2 }
 0x193   : > { %p1722_p7 = scmp.lt.u32.totalorder %s1720_s16, %s1716_s3  ;;  %p1724_p4 = scmp.lt.u32.totalorder %s1716_s3, %s2034_s7 }
 0x194   : > { %p1718_p1 = pnand %p1717_p9, %p1910_p10 }
 0x195   : > { %p1723_p13 = por %p1722_p7, %p1721_p3 }
 0x196   : > { %p1719_p2 = pneg %p1718_p1 }
 0x197   : > { %p1725_p6 = por %p1724_p4, %p1723_p13 }
 0x199   : > { %p1726_p8 = pnand %p1725_p6, %p1719_p2 }
 0x19b   : > { %1729 = shalt.err (!%p1726_p8)
}
 0x19c   : > { %s1797_s17 = smov 64   ;;  %s1798_s19 = smov 4  }
 0x19d   : > { %1507 = dma.vmem_to_hbm [thread:$0]  (%p1910_p10), %s2036_s4, 2048, %s2034_s7, %s1028_s12, %s1797_s17, %s1797_s17, %s1798_s19  }
 0x19e PF: > { %s1057_s21 = sand.u32 1, %s1768_s9   ;;  %p2107_p12 = scmp.ne.s32.totalorder %s2097_s20, 0 }
 0x19f   : > { %p2108_p11 = scmp.ge.s32.totalorder %s1788_s14, 2  ;;  %s1058_s5 = scalar_lea.sflag [#allocation5], %s1057_s21 }
 0x1a1   : > { %p1518_p0 = pnand %p2108_p11, %p2107_p12 }
 0x1a3   : > { %1763 = dma.done.wait (!%p1518_p0), %s1058_s5, 2048  }
 0x1a4   : > { %1765 = vsyncadd (!%p1518_p0), %s1058_s5, 4294965248  ;;  %s19_s14 = sadd.s32 1, %s1788_s14   ;;  %s2109_s9 = smov %s1772_s10 }
 0x1a5   : > { %p16_p5 = scmp.ge.s32.totalorder %s19_s14, 4   ;;  %s2110_s10 = smov %s1776_s11 }
 0x1a6   : > { %s2111_s11 = smov %s1919_s28  ;;  %s2112_s12 = smov %s1784_s13 }
 0x1a7   : > { %s2113_s13 = smov %s2115_s25  ;;  %18 = sbr.rel (!%p16_p5) target bundleno = 7 (0x7), region = 86 }
 0x1ae   :  { %1063 = vsyncpa [#allocation4], 1 }
 0x1af   :  { %1065 = vsyncpa [#allocation4 + $0x1], 1 }
 0x1b0   :  { %1066 = vsyncpa [#allocation7], 1 }
 0x1b1   :  { %1067 = vsyncpa [#allocation5], 1 }
 0x1b2   :  { %1069 = vsyncpa [#allocation5 + $0x1], 1 }

</bundles_post_ra>
